<compile_context>
chip_gen: v5e
topology: v5e:2x2
jax: 0.10.0
libtpu: 0.0.40
codegen_flags: <defaults>
</compile_context>

<pallas_src>
import functools

import jax
import jax.numpy as jnp
from jax import lax
from jax.experimental import pallas as pl
from jax.experimental.pallas import tpu as pltpu

_EPS = 1e-5


# ---------------------------------------------------------------------------
# Pallas kernel: one lane-dense tile of BN_tile slabs, laid out (channels, L)
# with L = BN_tile * T.
# ---------------------------------------------------------------------------
def attention_kernel(xf_ref, tpos_ref, maskT_ref,
                     wq_ref, wk_ref, wv_ref, wo_ref,
                     wf1_ref, bf1_ref, wf2_ref, bf2_ref,
                     out_ref, *, n_res, kernel_size):
    f32 = jnp.float32
    bf16 = jnp.bfloat16

    x32 = xf_ref[0]                      # (Ct, L) f32 (residual must stay f32)
    xb = x32.astype(bf16)                # bf16 operand for every MXU matmul
    L = x32.shape[-1]
    tpos = tpos_ref[...]                 # (1, L) int32: time index within slab

    def causal_proj(w):                  # w: (K, H, Ct) bf16, causal conv as matmuls
        acc = None
        for j in range(kernel_size):
            s = kernel_size - 1 - j      # temporal shift of tap j
            pj = jnp.dot(w[j], xb, preferred_element_type=f32)      # (H, L)
            if s > 0:
                # shift right by s along the flat lane axis, then zero the
                # first s time-steps of every slab (conv zero padding + no
                # cross-slab leakage).
                shifted = jnp.concatenate(
                    [jnp.zeros((pj.shape[0], s), f32), pj[:, :L - s]], axis=-1)
                pj = jnp.where(tpos >= s, shifted, 0.0)
            acc = pj if acc is None else acc + pj
        return acc

    q = causal_proj(wq_ref[...])                                    # (H, L) f32
    k = causal_proj(wk_ref[...])                                    # (H, L) f32
    v = jnp.dot(wv_ref[...], xb, preferred_element_type=f32)        # (H, L) f32

    # Key-major scores: st[r, p] = sum_h k[h, r] * q[h, p]  (= S^T), so the
    # PV product below is a plain, un-transposed matmul.
    st = lax.dot_general(k.astype(bf16), q.astype(bf16),
                         (((0,), (0,)), ((), ())),
                         preferred_element_type=f32)                # (L, L)
    # Host-precomputed additive mask: 0 (allowed) / -1000 (causal future,
    # matching the PyTorch module) / -1e9 (different slab).
    st = st + maskT_ref[...]

    # Softmax over the key axis (axis 0 in key-major layout), in f32.
    st = st - jnp.max(st, axis=0, keepdims=True)
    p = jnp.exp(st)
    p = p * pl.reciprocal(jnp.sum(p, axis=0, keepdims=True), approx=True)

    # attn_out[h, p] = sum_r v[h, r] * p[r, p]
    attn_out = jnp.dot(v.astype(bf16), p.astype(bf16),
                       preferred_element_type=f32)                  # (H, L)

    o = jnp.dot(wo_ref[...], attn_out.astype(bf16),
                preferred_element_type=f32)                         # (c, L)
    # Residual = raw input channels = first c rows of the x_f tile.
    out_f = x32[:n_res, :] + o

    h1 = jnp.dot(wf1_ref[...], out_f.astype(bf16),
                 preferred_element_type=f32) + bf1_ref[...]
    h1 = jnp.maximum(h1, 0.0)
    ff = jnp.dot(wf2_ref[...], h1.astype(bf16),
                 preferred_element_type=f32) + bf2_ref[...]

    out_ref[0] = out_f + ff


# ---------------------------------------------------------------------------
# Plain-JAX glue: norms + concat + permutes (not the hot path).
# ---------------------------------------------------------------------------
def _build_features(x, params, tnorm_bool, snorm_bool, stnorm_bool):
    b, c, n, t = x.shape
    x_list = [x]
    if tnorm_bool:  # BatchNorm1d over (b, t) per (c*n) channel
        x2 = x.reshape(b, c * n, t)
        mean = jnp.mean(x2, axis=(0, 2), keepdims=True)
        var = jnp.mean((x2 - mean) ** 2, axis=(0, 2), keepdims=True)
        xt = (x2 - mean) / jnp.sqrt(var + _EPS)
        xt = xt * params["tn_w"][None, :, None] + params["tn_b"][None, :, None]
        x_list.append(xt.reshape(b, c, n, t))
    if snorm_bool:  # InstanceNorm1d over n per (b*t, c)
        xp = jnp.transpose(x, (0, 3, 1, 2)).reshape(b * t, c, n)
        mean = jnp.mean(xp, axis=-1, keepdims=True)
        var = jnp.mean((xp - mean) ** 2, axis=-1, keepdims=True)
        xs = (xp - mean) / jnp.sqrt(var + _EPS)
        xs = xs * params["sn_w"][None, :, None] + params["sn_b"][None, :, None]
        x_list.append(jnp.transpose(xs.reshape(b, t, c, n), (0, 2, 3, 1)))
    if stnorm_bool:  # InstanceNorm2d over (n, t) per (b, c)
        mean = jnp.mean(x, axis=(2, 3), keepdims=True)
        var = jnp.mean((x - mean) ** 2, axis=(2, 3), keepdims=True)
        xst = (x - mean) / jnp.sqrt(var + _EPS)
        xst = xst * params["stn_w"][None, :, None, None] + params["stn_b"][None, :, None, None]
        x_list.append(xst)

    x_cat = jnp.concatenate(x_list, axis=1)                          # (b, num*c, n, t)
    Ct = x_cat.shape[1]
    x_f = jnp.transpose(x_cat, (0, 2, 1, 3)).reshape(b * n, Ct, t)   # (b*n, num*c, t)
    input_f = jnp.transpose(x, (0, 2, 1, 3)).reshape(b * n, c, t)    # (b*n, c, t)
    return x_f, input_f


def _pick_bn_tile(BN, T, target_lanes=512):
    """Biggest slab tile with ~target lane width, keeping >=2 grid steps when
    possible (v7x has 2 TensorCores) and dividing BN evenly."""
    tile = max(1, min(BN, -(-target_lanes // T)))
    if BN >= 2:
        tile = min(tile, max(1, BN // 2))
    while BN % tile:
        tile -= 1
    return tile


def attention_forward(x, params, *, key_kernel_size,
                      tnorm_bool, snorm_bool, stnorm_bool):
    b, c, n, t = x.shape
    K = key_kernel_size
    H = params["q_w"].shape[0]

    x_f, _ = _build_features(x, params, tnorm_bool, snorm_bool, stnorm_bool)
    BN, Ct, T = x_f.shape

    bn_tile = _pick_bn_tile(BN, T)
    n_tiles = BN // bn_tile
    L = bn_tile * T

    # (BN, Ct, T) -> (n_tiles, Ct, bn_tile*T): lane-dense slabs per tile.
    xf_t = (x_f.reshape(n_tiles, bn_tile, Ct, T)
                .transpose(0, 2, 1, 3)
                .reshape(n_tiles, Ct, L)).astype(jnp.float32)

    # Host-precomputed, loop-invariant tensors (resident inputs).
    r = jnp.arange(L)
    slab = r // T
    tt = r % T
    same = slab[:, None] == slab[None, :]
    future = tt[:, None] > tt[None, :]          # key time > query time
    maskT = jnp.where(same, jnp.where(future, -1000.0, 0.0), -1e9).astype(jnp.float32)
    tpos = tt.astype(jnp.int32)[None, :]        # (1, L)

    bf16 = jnp.bfloat16
    wq = jnp.transpose(params["q_w"], (2, 0, 1)).astype(bf16)   # (K, H, Ct)
    wk = jnp.transpose(params["k_w"], (2, 0, 1)).astype(bf16)   # (K, H, Ct)
    wv = params["v_w"][:, :, 0].astype(bf16)                    # (H, Ct)
    wo = params["o_w"][:, :, 0].astype(bf16)                    # (c, H)
    wf1 = params["ff1_w"][:, :, 0].astype(bf16)                 # (c, c)
    wf2 = params["ff2_w"][:, :, 0].astype(bf16)                 # (c, c)
    bf1 = params["ff1_b"][:, None].astype(jnp.float32)          # (c, 1)
    bf2 = params["ff2_b"][:, None].astype(jnp.float32)          # (c, 1)

    kern = functools.partial(attention_kernel, n_res=c, kernel_size=K)

    out_t = pl.pallas_call(
        kern,
        out_shape=jax.ShapeDtypeStruct((n_tiles, c, L), jnp.float32),
        grid_spec=pltpu.PrefetchScalarGridSpec(
            num_scalar_prefetch=0,
            grid=(n_tiles,),
            in_specs=[
                pl.BlockSpec((1, Ct, L), lambda i: (i, 0, 0)),    # x_f tile
                pl.BlockSpec((1, L), lambda i: (0, 0)),           # tpos (resident)
                pl.BlockSpec((L, L), lambda i: (0, 0)),           # mask (resident)
                pl.BlockSpec((K, H, Ct), lambda i: (0, 0, 0)),    # Wq taps
                pl.BlockSpec((K, H, Ct), lambda i: (0, 0, 0)),    # Wk taps
                pl.BlockSpec((H, Ct), lambda i: (0, 0)),          # Wv
                pl.BlockSpec((c, H), lambda i: (0, 0)),           # Wo
                pl.BlockSpec((c, c), lambda i: (0, 0)),           # Wff1
                pl.BlockSpec((c, 1), lambda i: (0, 0)),           # bff1
                pl.BlockSpec((c, c), lambda i: (0, 0)),           # Wff2
                pl.BlockSpec((c, 1), lambda i: (0, 0)),           # bff2
            ],
            out_specs=pl.BlockSpec((1, c, L), lambda i: (i, 0, 0)),
        ),
        compiler_params=pltpu.CompilerParams(
            dimension_semantics=("parallel",)),
    )(xf_t, tpos, maskT, wq, wk, wv, wo, wf1, bf1, wf2, bf2)

    # (n_tiles, c, L) -> (b, c, n, t)
    out = (out_t.reshape(n_tiles, c, bn_tile, T)
                .transpose(0, 2, 1, 3)
                .reshape(b, n, c, t)
                .transpose(0, 2, 1, 3))
    return out


# ---------------------------------------------------------------------------
# Pure-JAX reference (lax.conv) to sanity-check the Pallas kernel.
# ---------------------------------------------------------------------------
def _conv1d(x, w, pad):
    return lax.conv_general_dilated(
        x, w, window_strides=(1,), padding=[(pad, pad)],
        dimension_numbers=("NCH", "OIH", "NCH"))


def reference_forward(x, params, *, key_kernel_size,
                      tnorm_bool, snorm_bool, stnorm_bool):
    b, c, n, t = x.shape
    K = key_kernel_size
    x_f, input_f = _build_features(x, params, tnorm_bool, snorm_bool, stnorm_bool)

    q = _conv1d(x_f, params["q_w"], K - 1)[:, :, :t]   # chomp
    k = _conv1d(x_f, params["k_w"], K - 1)[:, :, :t]   # chomp
    v = _conv1d(x_f, params["v_w"], 0)

    attn = jnp.einsum("bht,bhs->bts", q, k)
    mask = jnp.triu(jnp.ones((t, t), jnp.float32), k=1)
    attn = attn - 1000.0 * mask[None]
    attn = jax.nn.softmax(attn, axis=-1)
    attn_out = jnp.einsum("bts,bhs->bht", attn, v)

    out_f = input_f + _conv1d(attn_out, params["o_w"], 0)
    h1 = jax.nn.relu(_conv1d(out_f, params["ff1_w"], 0) + params["ff1_b"][None, :, None])
    ff = _conv1d(h1, params["ff2_w"], 0) + params["ff2_b"][None, :, None]
    out_f = out_f + ff
    return jnp.transpose(out_f.reshape(b, n, c, t), (0, 2, 1, 3))


# ---------------------------------------------------------------------------
if __name__ == "__main__":
    # Input (b, in_channels, num_nodes, t), consistent with the module.
    b, c, n, t = 2, 8, 4, 8
    K = 3                       # key_kernel_size
    tnorm_bool = snorm_bool = stnorm_bool = True
    num = 1 + int(tnorm_bool) + int(snorm_bool) + int(stnorm_bool)
    H = c // 2                  # hidden_channels
    Ct = num * c

    keys = jax.random.split(jax.random.PRNGKey(0), 16)
    f32 = jnp.float32

    def u(key, shape, fan_in):  # PyTorch Conv1d default init: U(-1/sqrt(fan_in), +)
        bound = 1.0 / (fan_in ** 0.5)
        return jax.random.uniform(key, shape, f32, -bound, bound)

    params = {
        # norm affine params (PyTorch default weight=1, bias=0; perturbed)
        "tn_w": 1.0 + 0.1 * jax.random.normal(keys[0], (c * n,), f32),
        "tn_b": 0.1 * jax.random.normal(keys[1], (c * n,), f32),
        "sn_w": 1.0 + 0.1 * jax.random.normal(keys[2], (c,), f32),
        "sn_b": 0.1 * jax.random.normal(keys[3], (c,), f32),
        "stn_w": 1.0 + 0.1 * jax.random.normal(keys[4], (c,), f32),
        "stn_b": 0.1 * jax.random.normal(keys[5], (c,), f32),
        # conv weights (PyTorch Conv1d layout: (out_ch, in_ch, K))
        "q_w": u(keys[6], (H, Ct, K), Ct * K),
        "k_w": u(keys[7], (H, Ct, K), Ct * K),
        "v_w": u(keys[8], (H, Ct, 1), Ct),
        "o_w": u(keys[9], (c, H, 1), H),
        "ff1_w": u(keys[10], (c, c, 1), c),
        "ff1_b": u(keys[11], (c,), c),
        "ff2_w": u(keys[12], (c, c, 1), c),
        "ff2_b": u(keys[13], (c,), c),
    }
    x = jax.random.normal(keys[14], (b, c, n, t), f32)

    run = functools.partial(attention_forward, key_kernel_size=K,
                            tnorm_bool=tnorm_bool, snorm_bool=snorm_bool,
                            stnorm_bool=stnorm_bool)
    out = jax.block_until_ready(run(x, params))
    assert out.shape == (b, c, n, t), out.shape

    ref = reference_forward(x, params, key_kernel_size=K,
                            tnorm_bool=tnorm_bool, snorm_bool=snorm_bool,
                            stnorm_bool=stnorm_bool)
    max_err = float(jnp.max(jnp.abs(out - ref)))
    # bf16 MXU operands (f32 accumulation, f32 softmax) vs the pure-f32 reference.
    if max_err > 1e-1:
        raise AssertionError(f"Pallas kernel mismatch vs reference: {max_err}")

    print("KERNEL_OK")
</pallas_src>

<mosaic_0001>
module attributes {stable_mosaic.version = 11 : i64} {
  func.func @attention_kernel(%arg0: i32, %arg1: memref<1x32x32xf32, #tpu.memory_space<vmem>>, %arg2: memref<1x32xi32, #tpu.memory_space<vmem>>, %arg3: memref<32x32xf32, #tpu.memory_space<vmem>>, %arg4: memref<3x4x32xbf16, #tpu.memory_space<vmem>>, %arg5: memref<3x4x32xbf16, #tpu.memory_space<vmem>>, %arg6: memref<4x32xbf16, #tpu.memory_space<vmem>>, %arg7: memref<8x4xbf16, #tpu.memory_space<vmem>>, %arg8: memref<8x8xbf16, #tpu.memory_space<vmem>>, %arg9: memref<8x1xf32, #tpu.memory_space<vmem>>, %arg10: memref<8x8xbf16, #tpu.memory_space<vmem>>, %arg11: memref<8x1xf32, #tpu.memory_space<vmem>>, %arg12: memref<1x8x32xf32, #tpu.memory_space<vmem>>) attributes {dimension_semantics = [#tpu.dimension_semantics<parallel>], iteration_bounds = array<i64: 2>, scalar_prefetch = 0 : i64, scratch_operands = 0 : i64, tpu.core_type = #tpu.core_type<tc>, window_params = [{transform_indices = @transform_0, window_bounds = array<i64: 1, 32, 32>}, {pipeline_mode = #tpu.pipeline_mode<synchronous>, transform_indices = @transform_1, window_bounds = array<i64: 1, 32>}, {pipeline_mode = #tpu.pipeline_mode<synchronous>, transform_indices = @transform_2, window_bounds = array<i64: 32, 32>}, {pipeline_mode = #tpu.pipeline_mode<synchronous>, transform_indices = @transform_3, window_bounds = array<i64: 3, 4, 32>}, {pipeline_mode = #tpu.pipeline_mode<synchronous>, transform_indices = @transform_4, window_bounds = array<i64: 3, 4, 32>}, {pipeline_mode = #tpu.pipeline_mode<synchronous>, transform_indices = @transform_5, window_bounds = array<i64: 4, 32>}, {pipeline_mode = #tpu.pipeline_mode<synchronous>, transform_indices = @transform_6, window_bounds = array<i64: 8, 4>}, {pipeline_mode = #tpu.pipeline_mode<synchronous>, transform_indices = @transform_7, window_bounds = array<i64: 8, 8>}, {pipeline_mode = #tpu.pipeline_mode<synchronous>, transform_indices = @transform_8, window_bounds = array<i64: 8, 1>}, {pipeline_mode = #tpu.pipeline_mode<synchronous>, transform_indices = @transform_9, window_bounds = array<i64: 8, 8>}, {pipeline_mode = #tpu.pipeline_mode<synchronous>, transform_indices = @transform_10, window_bounds = array<i64: 8, 1>}, {transform_indices = @transform_11, window_bounds = array<i64: 1, 8, 32>}]} {
    %c0 = arith.constant 0 : index
    %c0_0 = arith.constant 0 : index
    %c0_1 = arith.constant 0 : index
    %0 = vector.load %arg1[%c0, %c0_0, %c0_1] : memref<1x32x32xf32, #tpu.memory_space<vmem>>, vector<1x32x32xf32>
    %1 = vector.shape_cast %0 : vector<1x32x32xf32> to vector<32x32xf32>
    %2 = arith.truncf %1 : vector<32x32xf32> to vector<32x32xbf16>
    %c0_2 = arith.constant 0 : index
    %c0_3 = arith.constant 0 : index
    %3 = vector.load %arg2[%c0_2, %c0_3] : memref<1x32xi32, #tpu.memory_space<vmem>>, vector<1x32xi32>
    %c0_4 = arith.constant 0 : index
    %c0_5 = arith.constant 0 : index
    %c0_6 = arith.constant 0 : index
    %4 = vector.load %arg4[%c0_4, %c0_5, %c0_6] : memref<3x4x32xbf16, #tpu.memory_space<vmem>>, vector<3x4x32xbf16>
    %5 = vector.extract_strided_slice %4 {offsets = [0, 0, 0], sizes = [1, 4, 32], strides = [1, 1, 1]} : vector<3x4x32xbf16> to vector<1x4x32xbf16>
    %6 = vector.shape_cast %5 : vector<1x4x32xbf16> to vector<4x32xbf16>
    %cst = arith.constant dense<0.000000e+00> : vector<4x32xf32>
    %7 = tpu.matmul %6, %2, %cst {dimension_numbers = #tpu.dot_dimension_numbers<[1], [0], [0], [1], [0, 0, 1, 1], [], []>} : vector<4x32xbf16>, vector<32x32xbf16>, vector<4x32xf32> -> vector<4x32xf32>
    %cst_7 = arith.constant 0.000000e+00 : f32
    %8 = vector.broadcast %cst_7 : f32 to vector<4x2xf32>
    %9 = vector.extract_strided_slice %7 {offsets = [0, 0], sizes = [4, 30], strides = [1, 1]} : vector<4x32xf32> to vector<4x30xf32>
    %10 = tpu.concatenate %8, %9 in 1 : vector<4x2xf32>, vector<4x30xf32> -> vector<4x32xf32>
    %c2_i32 = arith.constant 2 : i32
    %11 = vector.broadcast %c2_i32 : i32 to vector<1x32xi32>
    %12 = arith.cmpi sge, %3, %11 : vector<1x32xi32>
    %cst_8 = arith.constant 0.000000e+00 : f32
    %13 = vector.shape_cast %12 : vector<1x32xi1> to vector<1x32xi1>
    %14 = vector.broadcast %13 : vector<1x32xi1> to vector<4x32xi1>
    %15 = vector.broadcast %cst_8 : f32 to vector<4x32xf32>
    %16 = arith.select %14, %10, %15 : vector<4x32xi1>, vector<4x32xf32>
    %17 = vector.extract_strided_slice %4 {offsets = [1, 0, 0], sizes = [1, 4, 32], strides = [1, 1, 1]} : vector<3x4x32xbf16> to vector<1x4x32xbf16>
    %18 = vector.shape_cast %17 : vector<1x4x32xbf16> to vector<4x32xbf16>
    %cst_9 = arith.constant dense<0.000000e+00> : vector<4x32xf32>
    %19 = tpu.matmul %18, %2, %cst_9 {dimension_numbers = #tpu.dot_dimension_numbers<[1], [0], [0], [1], [0, 0, 1, 1], [], []>} : vector<4x32xbf16>, vector<32x32xbf16>, vector<4x32xf32> -> vector<4x32xf32>
    %cst_10 = arith.constant 0.000000e+00 : f32
    %20 = vector.broadcast %cst_10 : f32 to vector<4x1xf32>
    %21 = vector.extract_strided_slice %19 {offsets = [0, 0], sizes = [4, 31], strides = [1, 1]} : vector<4x32xf32> to vector<4x31xf32>
    %22 = tpu.concatenate %20, %21 in 1 : vector<4x1xf32>, vector<4x31xf32> -> vector<4x32xf32>
    %c1_i32 = arith.constant 1 : i32
    %23 = vector.broadcast %c1_i32 : i32 to vector<1x32xi32>
    %24 = arith.cmpi sge, %3, %23 : vector<1x32xi32>
    %cst_11 = arith.constant 0.000000e+00 : f32
    %25 = vector.shape_cast %24 : vector<1x32xi1> to vector<1x32xi1>
    %26 = vector.broadcast %25 : vector<1x32xi1> to vector<4x32xi1>
    %27 = vector.broadcast %cst_11 : f32 to vector<4x32xf32>
    %28 = arith.select %26, %22, %27 : vector<4x32xi1>, vector<4x32xf32>
    %29 = arith.addf %16, %28 : vector<4x32xf32>
    %30 = vector.extract_strided_slice %4 {offsets = [2, 0, 0], sizes = [1, 4, 32], strides = [1, 1, 1]} : vector<3x4x32xbf16> to vector<1x4x32xbf16>
    %31 = vector.shape_cast %30 : vector<1x4x32xbf16> to vector<4x32xbf16>
    %cst_12 = arith.constant dense<0.000000e+00> : vector<4x32xf32>
    %32 = tpu.matmul %31, %2, %cst_12 {dimension_numbers = #tpu.dot_dimension_numbers<[1], [0], [0], [1], [0, 0, 1, 1], [], []>} : vector<4x32xbf16>, vector<32x32xbf16>, vector<4x32xf32> -> vector<4x32xf32>
    %33 = arith.addf %29, %32 : vector<4x32xf32>
    %c0_13 = arith.constant 0 : index
    %c0_14 = arith.constant 0 : index
    %c0_15 = arith.constant 0 : index
    %34 = vector.load %arg5[%c0_13, %c0_14, %c0_15] : memref<3x4x32xbf16, #tpu.memory_space<vmem>>, vector<3x4x32xbf16>
    %35 = vector.extract_strided_slice %34 {offsets = [0, 0, 0], sizes = [1, 4, 32], strides = [1, 1, 1]} : vector<3x4x32xbf16> to vector<1x4x32xbf16>
    %36 = vector.shape_cast %35 : vector<1x4x32xbf16> to vector<4x32xbf16>
    %cst_16 = arith.constant dense<0.000000e+00> : vector<4x32xf32>
    %37 = tpu.matmul %36, %2, %cst_16 {dimension_numbers = #tpu.dot_dimension_numbers<[1], [0], [0], [1], [0, 0, 1, 1], [], []>} : vector<4x32xbf16>, vector<32x32xbf16>, vector<4x32xf32> -> vector<4x32xf32>
    %cst_17 = arith.constant 0.000000e+00 : f32
    %38 = vector.broadcast %cst_17 : f32 to vector<4x2xf32>
    %39 = vector.extract_strided_slice %37 {offsets = [0, 0], sizes = [4, 30], strides = [1, 1]} : vector<4x32xf32> to vector<4x30xf32>
    %40 = tpu.concatenate %38, %39 in 1 : vector<4x2xf32>, vector<4x30xf32> -> vector<4x32xf32>
    %c2_i32_18 = arith.constant 2 : i32
    %41 = vector.broadcast %c2_i32_18 : i32 to vector<1x32xi32>
    %42 = arith.cmpi sge, %3, %41 : vector<1x32xi32>
    %cst_19 = arith.constant 0.000000e+00 : f32
    %43 = vector.shape_cast %42 : vector<1x32xi1> to vector<1x32xi1>
    %44 = vector.broadcast %43 : vector<1x32xi1> to vector<4x32xi1>
    %45 = vector.broadcast %cst_19 : f32 to vector<4x32xf32>
    %46 = arith.select %44, %40, %45 : vector<4x32xi1>, vector<4x32xf32>
    %47 = vector.extract_strided_slice %34 {offsets = [1, 0, 0], sizes = [1, 4, 32], strides = [1, 1, 1]} : vector<3x4x32xbf16> to vector<1x4x32xbf16>
    %48 = vector.shape_cast %47 : vector<1x4x32xbf16> to vector<4x32xbf16>
    %cst_20 = arith.constant dense<0.000000e+00> : vector<4x32xf32>
    %49 = tpu.matmul %48, %2, %cst_20 {dimension_numbers = #tpu.dot_dimension_numbers<[1], [0], [0], [1], [0, 0, 1, 1], [], []>} : vector<4x32xbf16>, vector<32x32xbf16>, vector<4x32xf32> -> vector<4x32xf32>
    %cst_21 = arith.constant 0.000000e+00 : f32
    %50 = vector.broadcast %cst_21 : f32 to vector<4x1xf32>
    %51 = vector.extract_strided_slice %49 {offsets = [0, 0], sizes = [4, 31], strides = [1, 1]} : vector<4x32xf32> to vector<4x31xf32>
    %52 = tpu.concatenate %50, %51 in 1 : vector<4x1xf32>, vector<4x31xf32> -> vector<4x32xf32>
    %c1_i32_22 = arith.constant 1 : i32
    %53 = vector.broadcast %c1_i32_22 : i32 to vector<1x32xi32>
    %54 = arith.cmpi sge, %3, %53 : vector<1x32xi32>
    %cst_23 = arith.constant 0.000000e+00 : f32
    %55 = vector.shape_cast %54 : vector<1x32xi1> to vector<1x32xi1>
    %56 = vector.broadcast %55 : vector<1x32xi1> to vector<4x32xi1>
    %57 = vector.broadcast %cst_23 : f32 to vector<4x32xf32>
    %58 = arith.select %56, %52, %57 : vector<4x32xi1>, vector<4x32xf32>
    %59 = arith.addf %46, %58 : vector<4x32xf32>
    %60 = vector.extract_strided_slice %34 {offsets = [2, 0, 0], sizes = [1, 4, 32], strides = [1, 1, 1]} : vector<3x4x32xbf16> to vector<1x4x32xbf16>
    %61 = vector.shape_cast %60 : vector<1x4x32xbf16> to vector<4x32xbf16>
    %cst_24 = arith.constant dense<0.000000e+00> : vector<4x32xf32>
    %62 = tpu.matmul %61, %2, %cst_24 {dimension_numbers = #tpu.dot_dimension_numbers<[1], [0], [0], [1], [0, 0, 1, 1], [], []>} : vector<4x32xbf16>, vector<32x32xbf16>, vector<4x32xf32> -> vector<4x32xf32>
    %63 = arith.addf %59, %62 : vector<4x32xf32>
    %c0_25 = arith.constant 0 : index
    %c0_26 = arith.constant 0 : index
    %64 = vector.load %arg6[%c0_25, %c0_26] : memref<4x32xbf16, #tpu.memory_space<vmem>>, vector<4x32xbf16>
    %cst_27 = arith.constant dense<0.000000e+00> : vector<4x32xf32>
    %65 = tpu.matmul %64, %2, %cst_27 {dimension_numbers = #tpu.dot_dimension_numbers<[1], [0], [0], [1], [0, 0, 1, 1], [], []>} : vector<4x32xbf16>, vector<32x32xbf16>, vector<4x32xf32> -> vector<4x32xf32>
    %66 = arith.truncf %63 : vector<4x32xf32> to vector<4x32xbf16>
    %67 = arith.truncf %33 : vector<4x32xf32> to vector<4x32xbf16>
    %cst_28 = arith.constant dense<0.000000e+00> : vector<32x32xf32>
    %68 = tpu.matmul %66, %67, %cst_28 {dimension_numbers = #tpu.dot_dimension_numbers<[0], [0], [1], [1], [0, 1, 1, 1], [], []>} : vector<4x32xbf16>, vector<4x32xbf16>, vector<32x32xf32> -> vector<32x32xf32>
    %c0_29 = arith.constant 0 : index
    %c0_30 = arith.constant 0 : index
    %69 = vector.load %arg3[%c0_29, %c0_30] : memref<32x32xf32, #tpu.memory_space<vmem>>, vector<32x32xf32>
    %70 = arith.addf %68, %69 : vector<32x32xf32>
    %cst_31 = arith.constant dense<0xFF800000> : vector<32xf32>
    %71 = vector.multi_reduction <maximumf>, %70, %cst_31 [0] : vector<32x32xf32> to vector<32xf32>
    %72 = vector.shape_cast %71 : vector<32xf32> to vector<1x32xf32>
    %73 = vector.broadcast %72 : vector<1x32xf32> to vector<32x32xf32>
    %74 = arith.subf %70, %73 : vector<32x32xf32>
    %75 = math.exp %74 : vector<32x32xf32>
    %cst_32 = arith.constant dense<0.000000e+00> : vector<32xf32>
    %76 = vector.multi_reduction <add>, %75, %cst_32 [0] : vector<32x32xf32> to vector<32xf32>
    %77 = vector.shape_cast %76 : vector<32xf32> to vector<1x32xf32>
    %78 = tpu.reciprocal %77 {approx = true} : vector<1x32xf32> -> vector<1x32xf32>
    %79 = vector.broadcast %78 : vector<1x32xf32> to vector<32x32xf32>
    %80 = arith.mulf %75, %79 : vector<32x32xf32>
    %81 = arith.truncf %65 : vector<4x32xf32> to vector<4x32xbf16>
    %82 = arith.truncf %80 : vector<32x32xf32> to vector<32x32xbf16>
    %cst_33 = arith.constant dense<0.000000e+00> : vector<4x32xf32>
    %83 = tpu.matmul %81, %82, %cst_33 {dimension_numbers = #tpu.dot_dimension_numbers<[1], [0], [0], [1], [0, 0, 1, 1], [], []>} : vector<4x32xbf16>, vector<32x32xbf16>, vector<4x32xf32> -> vector<4x32xf32>
    %c0_34 = arith.constant 0 : index
    %c0_35 = arith.constant 0 : index
    %84 = vector.load %arg7[%c0_34, %c0_35] : memref<8x4xbf16, #tpu.memory_space<vmem>>, vector<8x4xbf16>
    %85 = arith.truncf %83 : vector<4x32xf32> to vector<4x32xbf16>
    %cst_36 = arith.constant dense<0.000000e+00> : vector<8x32xf32>
    %86 = tpu.matmul %84, %85, %cst_36 {dimension_numbers = #tpu.dot_dimension_numbers<[1], [0], [0], [1], [0, 0, 1, 1], [], []>} : vector<8x4xbf16>, vector<4x32xbf16>, vector<8x32xf32> -> vector<8x32xf32>
    %87 = vector.extract_strided_slice %1 {offsets = [0, 0], sizes = [8, 32], strides = [1, 1]} : vector<32x32xf32> to vector<8x32xf32>
    %88 = arith.addf %87, %86 : vector<8x32xf32>
    %c0_37 = arith.constant 0 : index
    %c0_38 = arith.constant 0 : index
    %89 = vector.load %arg8[%c0_37, %c0_38] : memref<8x8xbf16, #tpu.memory_space<vmem>>, vector<8x8xbf16>
    %90 = arith.truncf %88 : vector<8x32xf32> to vector<8x32xbf16>
    %cst_39 = arith.constant dense<0.000000e+00> : vector<8x32xf32>
    %91 = tpu.matmul %89, %90, %cst_39 {dimension_numbers = #tpu.dot_dimension_numbers<[1], [0], [0], [1], [0, 0, 1, 1], [], []>} : vector<8x8xbf16>, vector<8x32xbf16>, vector<8x32xf32> -> vector<8x32xf32>
    %c0_40 = arith.constant 0 : index
    %c0_41 = arith.constant 0 : index
    %92 = vector.load %arg9[%c0_40, %c0_41] : memref<8x1xf32, #tpu.memory_space<vmem>>, vector<8x1xf32>
    %93 = vector.broadcast %92 : vector<8x1xf32> to vector<8x32xf32>
    %94 = arith.addf %91, %93 : vector<8x32xf32>
    %cst_42 = arith.constant 0.000000e+00 : f32
    %95 = vector.broadcast %cst_42 : f32 to vector<8x32xf32>
    %96 = arith.maximumf %94, %95 : vector<8x32xf32>
    %c0_43 = arith.constant 0 : index
    %c0_44 = arith.constant 0 : index
    %97 = vector.load %arg10[%c0_43, %c0_44] : memref<8x8xbf16, #tpu.memory_space<vmem>>, vector<8x8xbf16>
    %98 = arith.truncf %96 : vector<8x32xf32> to vector<8x32xbf16>
    %cst_45 = arith.constant dense<0.000000e+00> : vector<8x32xf32>
    %99 = tpu.matmul %97, %98, %cst_45 {dimension_numbers = #tpu.dot_dimension_numbers<[1], [0], [0], [1], [0, 0, 1, 1], [], []>} : vector<8x8xbf16>, vector<8x32xbf16>, vector<8x32xf32> -> vector<8x32xf32>
    %c0_46 = arith.constant 0 : index
    %c0_47 = arith.constant 0 : index
    %100 = vector.load %arg11[%c0_46, %c0_47] : memref<8x1xf32, #tpu.memory_space<vmem>>, vector<8x1xf32>
    %101 = vector.broadcast %100 : vector<8x1xf32> to vector<8x32xf32>
    %102 = arith.addf %99, %101 : vector<8x32xf32>
    %103 = arith.addf %88, %102 : vector<8x32xf32>
    %c0_48 = arith.constant 0 : index
    %c0_49 = arith.constant 0 : index
    %c0_50 = arith.constant 0 : index
    %104 = vector.load %arg12[%c0_48, %c0_49, %c0_50] : memref<1x8x32xf32, #tpu.memory_space<vmem>>, vector<1x8x32xf32>
    %105 = vector.shape_cast %104 : vector<1x8x32xf32> to vector<8x32xf32>
    %106 = vector.shape_cast %103 : vector<8x32xf32> to vector<1x8x32xf32>
    tpu.vector_store %arg12[%c0_48, %c0_49, %c0_50], %106 {strides = array<i32>} : memref<1x8x32xf32, #tpu.memory_space<vmem>>, vector<1x8x32xf32>,
    return
  }
  func.func @transform_0(%arg0: i32) -> (i32, i32, i32) {
    %c0_i32 = arith.constant 0 : i32
    %c0_i32_0 = arith.constant 0 : i32
    %c0_i32_1 = arith.constant 0 : i32
    return %arg0, %c0_i32, %c0_i32_0 : i32, i32, i32
  }
  func.func @transform_1(%arg0: i32) -> (i32, i32) {
    %c0_i32 = arith.constant 0 : i32
    %c0_i32_0 = arith.constant 0 : i32
    %c0_i32_1 = arith.constant 0 : i32
    return %c0_i32, %c0_i32_0 : i32, i32
  }
  func.func @transform_2(%arg0: i32) -> (i32, i32) {
    %c0_i32 = arith.constant 0 : i32
    %c0_i32_0 = arith.constant 0 : i32
    %c0_i32_1 = arith.constant 0 : i32
    return %c0_i32, %c0_i32_0 : i32, i32
  }
  func.func @transform_3(%arg0: i32) -> (i32, i32, i32) {
    %c0_i32 = arith.constant 0 : i32
    %c0_i32_0 = arith.constant 0 : i32
    %c0_i32_1 = arith.constant 0 : i32
    %c0_i32_2 = arith.constant 0 : i32
    return %c0_i32, %c0_i32_0, %c0_i32_1 : i32, i32, i32
  }
  func.func @transform_4(%arg0: i32) -> (i32, i32, i32) {
    %c0_i32 = arith.constant 0 : i32
    %c0_i32_0 = arith.constant 0 : i32
    %c0_i32_1 = arith.constant 0 : i32
    %c0_i32_2 = arith.constant 0 : i32
    return %c0_i32, %c0_i32_0, %c0_i32_1 : i32, i32, i32
  }
  func.func @transform_5(%arg0: i32) -> (i32, i32) {
    %c0_i32 = arith.constant 0 : i32
    %c0_i32_0 = arith.constant 0 : i32
    %c0_i32_1 = arith.constant 0 : i32
    return %c0_i32, %c0_i32_0 : i32, i32
  }
  func.func @transform_6(%arg0: i32) -> (i32, i32) {
    %c0_i32 = arith.constant 0 : i32
    %c0_i32_0 = arith.constant 0 : i32
    %c0_i32_1 = arith.constant 0 : i32
    return %c0_i32, %c0_i32_0 : i32, i32
  }
  func.func @transform_7(%arg0: i32) -> (i32, i32) {
    %c0_i32 = arith.constant 0 : i32
    %c0_i32_0 = arith.constant 0 : i32
    %c0_i32_1 = arith.constant 0 : i32
    return %c0_i32, %c0_i32_0 : i32, i32
  }
  func.func @transform_8(%arg0: i32) -> (i32, i32) {
    %c0_i32 = arith.constant 0 : i32
    %c0_i32_0 = arith.constant 0 : i32
    %c0_i32_1 = arith.constant 0 : i32
    return %c0_i32, %c0_i32_0 : i32, i32
  }
  func.func @transform_9(%arg0: i32) -> (i32, i32) {
    %c0_i32 = arith.constant 0 : i32
    %c0_i32_0 = arith.constant 0 : i32
    %c0_i32_1 = arith.constant 0 : i32
    return %c0_i32, %c0_i32_0 : i32, i32
  }
  func.func @transform_10(%arg0: i32) -> (i32, i32) {
    %c0_i32 = arith.constant 0 : i32
    %c0_i32_0 = arith.constant 0 : i32
    %c0_i32_1 = arith.constant 0 : i32
    return %c0_i32, %c0_i32_0 : i32, i32
  }
  func.func @transform_11(%arg0: i32) -> (i32, i32, i32) {
    %c0_i32 = arith.constant 0 : i32
    %c0_i32_0 = arith.constant 0 : i32
    %c0_i32_1 = arith.constant 0 : i32
    return %arg0, %c0_i32, %c0_i32_0 : i32, i32, i32
  }
}

</mosaic_0001>

<bundles_post_ra>
// kernel: tpu_custom_call.1
= control target key start
LH: loop header
LB: loop body
LE: loop exit
PB: predicated region body
PF: predicated region fallthrough
CT: control target
= control target key end

     0   :  { %s1472_s0 = inlined_call_operand.hbm [shape: f32[2,32,32], index: 0, kind: input, shape index: {}]   ;;  %s1473_s1 = inlined_call_operand.hbm [shape: s32[1,32], index: 1, kind: input, shape index: {}]   ;;  %s1474_s2 = inlined_call_operand.hbm [shape: f32[32,32], index: 2, kind: input, shape index: {}]   ;;  %s1475_s3 = inlined_call_operand.vmem [shape: bf16[3,4,32], index: 3, kind: input, shape index: {}]   ;;  %s1476_s4 = inlined_call_operand.vmem [shape: bf16[3,4,32], index: 4, kind: input, shape index: {}]   ;;  %s1477_s5 = inlined_call_operand.vmem [shape: bf16[4,32], index: 5, kind: input, shape index: {}]   ;;  %s1478_s6 = inlined_call_operand.vmem [shape: bf16[8,4], index: 6, kind: input, shape index: {}]   ;;  %s1479_s7 = inlined_call_operand.vmem [shape: bf16[8,8], index: 7, kind: input, shape index: {}]   ;;  %s1480_s8 = inlined_call_operand.vmem [shape: f32[8,1], index: 8, kind: input, shape index: {}]   ;;  %s1481_s9 = inlined_call_operand.vmem [shape: bf16[8,8], index: 9, kind: input, shape index: {}]   ;;  %s1482_s10 = inlined_call_operand.vmem [shape: f32[8,1], index: 10, kind: input, shape index: {}]   ;;  %s1483_s11 = inlined_call_operand.hbm [shape: f32[2,8,32], index: 11, kind: output, shape index: {}]  }
   0x1   :  { %1492 = sst [smem:[#allocation18_spill]] %s1473_s1 }
   0x2   :  { %1493 = sst [smem:[#allocation19_spill]] %s1474_s2 }
   0x3   :  { %1494 = sst [smem:[#allocation20_spill]] %s1481_s9 }
   0x4   :  { %1495 = sst [smem:[#allocation21_spill]] %s1483_s11 }
   0x5   :  { %16 = vsyncpa [#allocation3], 0 }
   0x6   :  { %18 = vsyncpa [#allocation3 + $0x1], 0 }
   0x7   :  { %19 = vsyncpa [#allocation6], 0 }
   0x8   :  { %20 = vsyncpa [#allocation4], 0 }
   0x9   :  { %22 = vsyncpa [#allocation4 + $0x1], 0  ;;  %s1248_s17 = smov 0   ;;  %s1250_s18 = smov 0  }
   0xa   :  { %s1252_s19 = smov 0   ;;  %s1254_s20 = smov 0  }
   0xb LB: > { %1496 = sst [smem:[#allocation12_spill]] %s1167_s17  ;;  %s1269_s21 = sadd.s32 4294967295, %s1179_s20   ;;  %s1179_s20 = sphi %s1254_s20, %s1520_s20   ;;  %s1175_s19 = sphi %s1252_s19, %s1522_s19   ;;  %s1171_s18 = sphi %s1250_s18, %s1524_s18   ;;  %s1167_s17 = sphi %s1248_s17, %s1523_s17  }
   0xc   : > { %1497 = sst [smem:[#allocation13_spill]] %s1175_s19  ;;  %s904_s22 = sadd.s32 4294967294, %s1179_s20  }
   0xd   : > { %s1273_s23 = sadd.s32 1, %s1179_s20   ;;  %s35_s24 = sadd.s32 1, %s1175_s19 }
   0xe   : > { %1498 = sst [smem:[#allocation14_spill]] %s1273_s23  ;;  %s32_s25 = ssub.s32 %s1179_s20, %s1273_s23 }
   0xf   : > { %p42_p0 = scmp.ne.s32.totalorder %s1175_s19, %s1171_s18  ;;  %p33_p1 = scmp.eq.s32.totalorder %s32_s25, 0 }
  0x10   : > { %p43_p2 = scmp.eq.s32.totalorder %s1179_s20, 0  ;;  %p48_p3 = scmp.ne.s32.totalorder %s1171_s18, %s1167_s17 }
  0x11   : > { %p49_p4 = scmp.eq.s32.totalorder %s1269_s21, 0  ;;  %p282_p7 = scmp.eq.s32.totalorder %s1269_s21, 1 }
  0x12   : > { %s1285_s26 = scalar_select %p33_p1, %s1175_s19, %s35_s24  }
  0x13   : > { %p1287_p5 = por %p43_p2, %p42_p0  ;;  %p1293_p6 = por %p49_p4, %p48_p3 }
  0x14   : > { %1499 = sst [smem:[#allocation15_spill]] %s1285_s26  ;;  %p288_p8 = scmp.eq.s32.totalorder %s904_s22, 1 }
  0x15   : > { %p905_p9 = scmp.ge.s32.totalorder %s1179_s20, 1  ;;  %p295_p10 = scmp.lt.s32.totalorder %s1179_s20, 3 }
  0x16   : > { %p1300_p11 = por %p282_p7, %p42_p0  ;;  %p1304_p12 = por %p288_p8, %p48_p3 }
  0x17   : > { %p1308_p13 = pnand %p905_p9, %p295_p10  ;;  %s1507_s1 = sld [smem:[#allocation18_spill]] }
  0x18   : > { %s1502_s29 = scalar_select %p1300_p11, 1, 0 }
  0x19   : > { %s1504_s30 = scalar_select %p1304_p12, 1, 0 }
  0x1a   : > { %1503 = sst [smem:[#allocation16_spill]] %s1502_s29  ;;  %p947_p1 = pneg %p1308_p13 }
  0x1b   : > { %1505 = sst [smem:[#allocation17_spill]] %s1504_s30  ;;  %s1181_s16 = smov [#allocation5]  }
  0x1c   : > { %s309_s22 = sshll.u32 %s1181_s16, 4  ;;  %p948_p2 = pnand %p947_p1, %p49_p4  ;;  %s310_s22 = int_to_ptr.vmem [resolvable:$true] %s309_s22 }
  0x1d   : > { %s307_s15 = sshll.u32 %s1507_s1, 4  ;;  %p964_p3 = scmp.lt.s32.totalorder %s1179_s20, 2  ;;  %s308_s15 = int_to_ptr.hbm [resolvable:$true] %s307_s15 }
  0x1e   : > { %s1508_s2 = sld [smem:[#allocation19_spill]]  ;;  %s1182_s14 = smov [#allocation7]  }
  0x1f   : > { %950 = dma.hbm_to_vmem [thread:$0]  (!%p948_p2), %s308_s15, 16, %s310_s22, [#allocation6]  }
  0x20   : > { %p1326_p7 = pnand %p964_p3, %p1287_p5  ;;  %s320_s1 = sshll.u32 %s1182_s14, 4  ;;  %s321_s1 = int_to_ptr.vmem [resolvable:$true] %s320_s1 }
  0x21   : > { %s358_s16 = sand.u32 1, %s1175_s19   ;;  %s1183_s23 = smov 128  }
  0x22   : > { %s1184_s30 = smov 8   ;;  %s909_s17 = sshll.u32 %s358_s16, 5 }
  0x23   : > { %s934_s29 = sshll.u32 %s1179_s20, 5  ;;  %s362_s15 = scalar_lea.vmem [#allocation2], %s909_s17 }
  0x24   : > { %s318_s26 = sshll.u32 %s1508_s2, 4  ;;  %s367_s25 = scalar_lea.hbm %s1472_s0, %s934_s29  ;;  %s319_s26 = int_to_ptr.hbm [resolvable:$true] %s318_s26 }
  0x25   : > { %953 = dma.hbm_to_vmem [thread:$0]  (!%p948_p2), %s319_s26, 512, %s321_s1, [#allocation6], %s1183_s23, %s1183_s23, %s1184_s30  }
  0x26   : > { %s370_s27 = sshll.u32 %s362_s15, 4  ;;  %s368_s22 = sshll.u32 %s367_s25, 4  ;;  %s371_s27 = int_to_ptr.vmem [resolvable:$true] %s370_s27  ;;  %s369_s22 = int_to_ptr.hbm [resolvable:$true] %s368_s22 }
  0x27   : > { %s359_s2 = scalar_lea.sflag [#allocation3], %s358_s16  ;;  %s1079_s9 = sshra.s32 %s369_s22, 4  ;;  %s1080_s9 = int_to_ptr.hbm [resolvable:$true] %s1079_s9 }
  0x28   : > { %s1081_s14 = scalar_lea.hbm %s1080_s9, 32  ;;  %p1083_p8 = pneg %p1326_p7 }
  0x29   : > { %p1082_p5 = scmp.ne.s32.totalorder %s1080_s9, %s1081_s14  ;;  %s1086_s19 = scalar_lea.hbm %s1472_s0, 64 }
  0x2a   : > { %p1087_p1 = scmp.lt.s32.totalorder %s1080_s9, %s1472_s0  ;;  %p1088_p2 = scmp.lt.s32.totalorder %s1086_s19, %s1081_s14 }
  0x2b   : > { %p1084_p9 = pnand %p1083_p8, %p1082_p5 }
  0x2c   : > { %p1089_p3 = por %p1088_p2, %p1087_p1 }
  0x2d   : > { %p1085_p10 = pneg %p1084_p9 }
  0x2f   : > { %p1090_p0 = pnand %p1089_p3, %p1085_p10 }
  0x31   : > { %1093 = shalt.err (!%p1090_p0)
}
  0x32   : > { %957 = dma.hbm_to_vmem [thread:$0]  (!%p1326_p7), %s369_s22, 512, %s371_s27, %s359_s2, %s1183_s23, %s1183_s23, %s1184_s30  }
  0x33   : > { %382 = sbr.rel (%p1308_p13) target bundleno = 1262 (0x4ee), region = 64  ;;  %s1348_s17 = sand.u32 (!%p1308_p13), 1, %s1171_s18  }
  0x34   : > { %s913_s16 = sshll.u32 (!%p1308_p13), %s1348_s17, 5  ;;  %s385_s24 = scalar_lea.sflag (!%p1308_p13), [#allocation3], %s1348_s17 }
  0x35   : > { %s388_s25 = scalar_lea.vmem (!%p1308_p13), [#allocation2], %s913_s16 }
  0x38   : > { %1154 = dma.done.wait (%p1293_p6), %s385_s24, 512  }
  0x39   : > { %1156 = vsyncadd (%p1293_p6), %s385_s24, 4294966784 }
  0x3a   : > { %1158 = dma.done.wait (%p49_p4), [#allocation6], 528  }
  0x3b   : > { %1160 = vsyncadd (%p49_p4), [#allocation6], 4294966768  ;;  %v441_v0 = vld [vmem:[%s388_s25 + $0x10] sm:$0xff]  ;;  %v442_v1 = vld [vmem:[%s388_s25 + $0x18] sm:$0xff]  ;;  %vm449_vm0 = vcmask 261120   ;;  %v1185_v12 = vmov 0  }
  0x3c   : > { %v1360_v2 = vld [vmem:[%s388_s25] sm:$0xff]  ;;  %v444_v3 = vpack.c.bf16 %v442_v1, %v441_v0  ;;  %v440_v4 = vld [vmem:[%s388_s25 + $0x8] sm:$0xff]  ;;  %1008 = vset.pattern.permute.xlu0 %v1185_v12  ;;  %s1186_s1 = smov 2   ;;  %s1187_s26 = smov 1   ;;  %vm470_vm3 = vcmask 15360   ;;  %vm497_vm4 = vcmask 7168  }
  0x3d   : > { %v443_v5 = vpack.c.bf16 %v440_v4, %v1360_v2  ;;  %v446_v6 = vld [vmem:[%s1475_s3] sm:$0x3]  ;;  %v447_v8 = vld [vmem:[%s1475_s3 + $0x2] sm:$0x3]  ;;  %v448_v9 = vld [vmem:[%s1475_s3 + $0x4] sm:$0x3] }
  0x3e   : > { %459 = vmatpush.bf16.msra.mxu0 %v444_v3  ;;  %534 = vmatpush.bf16.msra.mxu3 %v444_v3  ;;  %v522_v7 = vld [vmem:[%s1476_s4] sm:$0x3]  ;;  %v523_v10 = vld [vmem:[%s1476_s4 + $0x2] sm:$0x3]  ;;  %v524_v11 = vld [vmem:[%s1476_s4 + $0x4] sm:$0x3] }
  0x3f   : > { %486 = vmatpush.bf16.msra.mxu1 %v444_v3  ;;  %514 = vmatpush.bf16.msra.mxu2 %v444_v3  ;;  %v445_v25 = vld [vmem:[#allocation5] sm:$0x1]  ;;  %vm633_vm7 = vcmask 1041408   ;;  %vm626_vm8 = vcmask 31744   ;;  %v607_v57 = vld [vmem:[#allocation7 + $0x8] sm:$0xff]  ;;  %v606_v58 = vld [vmem:[#allocation7] sm:$0xff] }
  0x40   : > { %vm472_vm1 = vcmp.ge.s32.totalorder %v445_v25, 2  ;;  %vm499_vm2 = vcmp.ge.s32.totalorder %v445_v25, 1  ;;  %v587_v51 = vld [vmem:[%s1477_s5] sm:$0x3]  ;;  %v608_v59 = vld [vmem:[#allocation7 + $0x10] sm:$0xff]  ;;  %vm752_vm9 = vcmask 1043456  }
  0x41   : > { %v473_v26 = vsel %vm472_vm1, 1, %v1185_v12  ;;  %v500_v28 = vsel %vm499_vm2, 1, %v1185_v12  ;;  %v609_v61 = vld [vmem:[#allocation7 + $0x18] sm:$0xff]  ;;  %vm748_vm10 = vcmask 64512   ;;  %s1514_s13 = sld [smem:[#allocation20_spill]]  ;;  %s916_s15 = sshll.u32 %s1348_s17, 3 }
  0x42   : > { %460 = vmatpush.bf16.msra.mxu0 %v443_v5  ;;  %535 = vmatpush.bf16.msra.mxu3 %v443_v5  ;;  %v474_v29 = vperm.slane %v473_v26, 0  ;;  %v501_v30 = vperm.slane %v500_v28, 0  ;;  %s931_s27 = sshll.u32 %s1269_s21, 3  ;;  %s437_s29 = scalar_lea.vmem [#allocation8], %s916_s15 }
  0x43   : > { %487 = vmatpush.bf16.msra.mxu1 %v443_v5  ;;  %515 = vmatpush.bf16.msra.mxu2 %v443_v5  ;;  %s812_s16 = sshll.u32 %s437_s29, 4  ;;  %s800_s25 = scalar_lea.sflag [#allocation4], %s1348_s17  ;;  %s813_s16 = int_to_ptr.vmem [resolvable:$true] %s812_s16 }
  0x44   : > { %vm1387_vm5 = vcmp.eq.s32.totalorder %v474_v29, 1  ;;  %vm1391_vm6 = vcmp.eq.s32.totalorder %v501_v30, 1 }
  0x45   : > { %917 = vmatmul.msk.bf16.vlgmr.msra.gmra.mxu0 %vm449_vm0, %v446_v6  ;;  %920 = vmatmul.msk.bf16.vlgmr.msra.gmra.mxu3 %vm449_vm0, %v522_v7 }
  0x46   : > { %556 = vmatpush.bf16.msrb.mxu0 %v444_v3  ;;  %918 = vmatmul.msk.bf16.vlgmr.msra.gmra.mxu1 %vm449_vm0, %v447_v8 }
  0x47   : > { %579 = vmatpush.bf16.msrb.mxu1 %v444_v3  ;;  %597 = vmatpush.bf16.msrb.mxu2 %v444_v3 }
  0x48   : > { %919 = vmatmul.msk.bf16.vlgmr.msra.gmra.mxu2 %vm449_vm0, %v448_v9 }
  0x4a   : > { %557 = vmatpush.bf16.msrb.mxu0 %v443_v5 }
  0x4b   : > { %580 = vmatpush.bf16.msrb.mxu1 %v443_v5  ;;  %598 = vmatpush.bf16.msrb.mxu2 %v443_v5 }
  0x55   : > { %921 = vmatmul.msk.bf16.vlgmr.msrb.gmra.mxu0 %vm449_vm0, %v523_v10 }
  0x56   : > { %922 = vmatmul.msk.bf16.vlgmr.msrb.gmra.mxu1 %vm449_vm0, %v524_v11 }
  0x58   : > { %923 = vmatmul.msk.bf16.vlgmr.msrb.gmra.mxu2 %vm449_vm0, %v587_v51 }
  0xc2   : > { %v462_v13 = vpop.f32.mrf.mxu0 }
  0xc3   : > { %467 = vrot.lane.b32.xlu1 %v462_v13, %s1186_s1  ;;  %v489_v14 = vpop.f32.mrf.mxu1 }
  0xc8   : > { %v537_v15 = vpop.f32.mrf.mxu3 }
  0xc9   : > { %542 = vrot.lane.b32.xlu0 %v537_v15, %s1186_s1  ;;  %s1515_s1 = sld [smem:[#allocation21_spill]] }
  0xca   : > { %v464_v16 = vpop.f32.mrf.mxu0 }
  0xcb   : > { %494 = vrot.lane.b32.xlu1 %v489_v14, %s1187_s26  ;;  %v491_v17 = vpop.f32.mrf.mxu1  ;;  %v517_v21 = vpop.f32.mrf.mxu2 }
  0xcf   : > { %s1129_s23 = scalar_lea.hbm %s1515_s1, 16 }
  0xd0   : > { %v539_v18 = vpop.f32.mrf.mxu3 }
  0xd2   : > { %v559_v19 = vpop.f32.mrf.mxu0 }
  0xd3   : > { %564 = vrot.lane.b32.xlu0 %v559_v19, %s1187_s26  ;;  %v582_v22 = vpop.f32.mrf.mxu1  ;;  %v519_v23 = vpop.f32.mrf.mxu2  ;;  %s810_s26 = scalar_lea.hbm %s1515_s1, %s931_s27 }
  0xd4   : > { %s814_s24 = sshll.u32 %s810_s26, 4  ;;  %s815_s24 = int_to_ptr.hbm [resolvable:$true] %s814_s24 }
  0xd5   : > { %s1123_s2 = sshra.s32 %s815_s24, 4  ;;  %s1124_s2 = int_to_ptr.hbm [resolvable:$true] %s1123_s2 }
  0xd6   : > { %s1125_s21 = scalar_lea.hbm %s1124_s2, 8  ;;  %p1130_p0 = scmp.lt.s32.totalorder %s1124_s2, %s1515_s1 }
  0xd7   : > { %p1126_p4 = scmp.ne.s32.totalorder %s1124_s2, %s1125_s21  ;;  %p1131_p7 = scmp.lt.s32.totalorder %s1129_s23, %s1125_s21 }
  0xd9   : > { %p1127_p6 = pnand %p1126_p4, %p1300_p11  ;;  %p1132_p5 = por %p1131_p7, %p1130_p0 }
  0xda   : > { %v561_v20 = vpop.f32.mrf.mxu0 }
  0xdb   : > { %v584_v24 = vpop.f32.mrf.mxu1  ;;  %v600_v16 = vpop.f32.mrf.mxu2  ;;  %p1128_p13 = pneg %p1127_p6 }
  0xdd   : > { %p1133_p8 = pnand %p1132_p5, %p1128_p13 }
  0xe3   : > { %v602_v25 = vpop.f32.mrf.mxu2 }
 0x135   : > { %v468_v27 = vpop.permute.xlu1 %467 }
 0x136   : > { %v471_v33 = vsel %vm470_vm3, 0.0, %v468_v27 }
 0x137   : > { %v476_v37 = vsel %vm1387_vm5, %v471_v33, 0.0 }
 0x13b   : > { %v543_v31 = vpop.permute.xlu0 %542 }
 0x13c   : > { %v545_v41 = vsel %vm470_vm3, 0.0, %v543_v31 }
 0x13d   : > { %v495_v35 = vpop.permute.xlu1 %494  ;;  %v546_v46 = vsel %vm1387_vm5, %v545_v41, 0.0 }
 0x13e   : > { %v498_v36 = vsel %vm497_vm4, 0.0, %v495_v35 }
 0x13f   : > { %v503_v38 = vsel %vm1391_vm6, %v498_v36, 0.0 }
 0x140   : > { %v504_v39 = vadd.f32 %v503_v38, %v476_v37 }
 0x142   : > { %v521_v40 = vadd.f32 %v517_v21, %v504_v39 }
 0x144   : > { %v605_v42 = vpack.c.bf16 %v521_v40, %v521_v40 }
 0x145   : > { %v565_v43 = vpop.permute.xlu0 %564 }
 0x146   : > { %v567_v44 = vsel %vm497_vm4, 0.0, %v565_v43  ;;  %v635_v45 = vsel %vm633_vm7, %v605_v42, 0 }
 0x147   : > { %v568_v47 = vsel %vm1391_vm6, %v567_v44, 0.0  ;;  %644 = vmatpush.bf16.msrb.mxu3 %v635_v45 }
 0x148   : > { %v569_v48 = vadd.f32 %v568_v47, %v546_v46 }
 0x14a   : > { %v586_v49 = vadd.f32 %v582_v22, %v569_v48 }
 0x14c   : > { %v604_v50 = vpack.c.bf16 %v586_v49, %v586_v49 }
 0x14e   : > { %610 = vxpose.xlu2.c.b16.start.end [1/1] (short) (narrow) %v604_v50, 32  ;;  %v699_v50 = vpack.c.bf16 %v600_v16, %v600_v16 }
 0x1b0   : > { %1007 = vset.pattern.permute.xlu2 %v1185_v12 }
 0x1ef   : > { %v618_v52 = vpop.trf.xlu2 }
 0x1f0   : > { %924 = vmatmul.msk.bf16.vlgmr.msrb.gmra.mxu3 %vm626_vm8, %v618_v52 }
 0x1ff   : > { %v619_v53 = vpop.trf.xlu2 }
 0x200   : > { %925 = vmatmul.msk.bf16.gmra.mxu3 %vm626_vm8, %v619_v53 }
 0x273   : > { %v646_v54 = vpop.f32.mrf.mxu3 }
 0x274   : > { %v647_v62 = vadd.f32 %v646_v54, %v606_v58  ;;  %v718_v54 = vld [vmem:[%s1478_s6] sm:$0xf] }
 0x276   : > { %v656_v4 = vsel %vm449_vm0, %v647_v62, -inf }
 0x27b   : > { %v648_v55 = vpop.f32.mrf.mxu3 }
 0x27c   : > { %v649_v60 = vadd.f32 %v648_v55, %v607_v57 }
 0x27e   : > { %v657_v1 = vsel %vm449_vm0, %v649_v60, -inf }
 0x27f   : > { %v660_v7 = vmax.f32 %v656_v4, %v657_v1 }
 0x283   : > { %v651_v56 = vpop.f32.mrf.mxu3 }
 0x284   : > { %v652_v63 = vadd.f32 %v651_v56, %v608_v59  ;;  %v742_v56 = vld [vmem:[%s1480_s8] sm:$0xff] }
 0x285   : > { %745 = vperm.xlu2 %1007, %v742_v56  }
 0x286   : > { %v658_v5 = vsel %vm449_vm0, %v652_v63, -inf }
 0x28b   : > { %v653_v0 = vpop.f32.mrf.mxu3 }
 0x28c   : > { %v654_v3 = vadd.f32 %v653_v0, %v609_v61  ;;  %v740_v61 = vld [vmem:[%s1479_s7] sm:$0xf] }
 0x28e   : > { %v659_v6 = vsel %vm449_vm0, %v654_v3, -inf }
 0x28f   : > { %v661_v8 = vmax.f32 %v658_v5, %v659_v6 }
 0x291   : > { %v662_v9 = vmax.f32 %v660_v7, %v661_v8  ;;  %v770_v7 = vld [vmem:[%s1514_s13] sm:$0xf] }
 0x293   : > { %v663_v10 = vrot.slane %v662_v9, 4 }
 0x295   : > { %v664_v11 = vmax.f32 %v662_v9, %v663_v10 }
 0x297   : > { %v665_v12 = vrot.slane %v664_v11, 2 }
 0x299   : > { %v666_v13 = vmax.f32 %v664_v11, %v665_v12 }
 0x29b   : > { %v667_v14 = vrot.slane %v666_v13, 1 }
 0x29d   : > { %v668_v15 = vmax.f32 %v666_v13, %v667_v14 }
 0x29f   : > { %v669_v17 = vsub.f32 %v647_v62, %v668_v15  ;;  %v670_v18 = vsub.f32 %v649_v60, %v668_v15  ;;  %v671_v19 = vsub.f32 %v652_v63, %v668_v15  ;;  %v672_v20 = vsub.f32 %v654_v3, %v668_v15  ;;  %v772_v63 = vld [vmem:[%s1482_s10] sm:$0xff] }
 0x2a0   : > { %775 = vperm.xlu0 %1008, %v772_v63  }
 0x2a1   : > { %v673_v21 = vmul.f32 1.442695, %v669_v17  ;;  %v675_v22 = vmul.f32 1.442695, %v670_v18  ;;  %v677_v23 = vmul.f32 1.442695, %v671_v19 }
 0x2a2   : > { %v679_v24 = vmul.f32 1.442695, %v672_v20 }
 0x2a3   : > { %1009 = vpow2.f32 %v673_v21 }
 0x2a4   : > { %1011 = vpow2.f32 %v675_v22 }
 0x2a5   : > { %1013 = vpow2.f32 %v677_v23 }
 0x2a6   : > { %1015 = vpow2.f32 %v679_v24 }
 0x2a9   : > { %v1010_v26 = vpop.eup %1009 }
 0x2aa   : > { %v1012_v27 = vpop.eup %1011  ;;  %v681_v28 = vsel %vm449_vm0, %v1010_v26, 0.0 }
 0x2ab   : > { %v1014_v29 = vpop.eup %1013  ;;  %v682_v30 = vsel %vm449_vm0, %v1012_v27, 0.0 }
 0x2ac   : > { %v1016_v31 = vpop.eup %1015  ;;  %v683_v32 = vadd.f32 %v682_v30, %v681_v28  ;;  %v684_v33 = vsel %vm449_vm0, %v1014_v29, 0.0 }
 0x2ad   : > { %v686_v35 = vsel %vm449_vm0, %v1016_v31, 0.0 }
 0x2ae   : > { %v685_v34 = vadd.f32 %v684_v33, %v683_v32 }
 0x2b0   : > { %v687_v36 = vadd.f32 %v686_v35, %v685_v34 }
 0x2b2   : > { %v688_v37 = vrot.slane %v687_v36, 4 }
 0x2b4   : > { %v689_v38 = vadd.f32 %v688_v37, %v687_v36 }
 0x2b6   : > { %v690_v39 = vrot.slane %v689_v38, 2 }
 0x2b8   : > { %v691_v40 = vadd.f32 %v690_v39, %v689_v38 }
 0x2ba   : > { %v692_v41 = vrot.slane %v691_v40, 1 }
 0x2bc   : > { %v693_v42 = vadd.f32 %v692_v41, %v691_v40 }
 0x2be   : > { %1017 = vrcp.f32 %v693_v42 }
 0x2c4   : > { %v1018_v43 = vpop.eup %1017 }
 0x2c5   : > { %v697_v44 = vmul.f32 %v1018_v43, %v1014_v29  ;;  %v698_v45 = vmul.f32 %v1018_v43, %v1016_v31  ;;  %v695_v47 = vmul.f32 %v1018_v43, %v1010_v26  ;;  %v696_v48 = vmul.f32 %v1018_v43, %v1012_v27 }
 0x2c7   : > { %v701_v46 = vpack.c.bf16 %v698_v45, %v697_v44  ;;  %v700_v49 = vpack.c.bf16 %v696_v48, %v695_v47 }
 0x2c9   : > { %711 = vmatpush.bf16.msra.mxu0 %v701_v46 }
 0x2cd   : > { %712 = vmatpush.bf16.msra.mxu0 %v700_v49 }
 0x2d0   : > { %926 = vmatmul.msk.bf16.vlgmr.msra.gmra.mxu0 %vm449_vm0, %v699_v50 }
 0x2df   : > { %v746_v0 = vpop.permute.xlu2 %745 }
 0x312   : > { %v776_v8 = vpop.permute.xlu0 %775 }
 0x34d   : > { %v714_v51 = vpop.f32.mrf.mxu0 }
 0x34e   : > { %v719_v52 = vpack.c.bf16 %v714_v51, %v714_v51 }
 0x350   : > { %v724_v53 = vsel %vm633_vm7, %v719_v52, 0 }
 0x351   : > { %733 = vmatpush.bf16.msra.mxu1 %v724_v53 }
 0x354   : > { %927 = vmatmul.msk.bf16.vlgmr.msra.gmra.mxu1 %vm626_vm8, %v718_v54 }
 0x355   : > { %v716_v55 = vpop.f32.mrf.mxu0 }
 0x3d1   : > { %v735_v57 = vpop.f32.mrf.mxu1 }
 0x3d2   : > { %v739_v58 = vadd.f32 %v735_v57, %v1360_v2 }
 0x3d4   : > { %v741_v59 = vpack.c.bf16 %v739_v58, %v739_v58 }
 0x3d6   : > { %v754_v60 = vsel %vm752_vm9, %v741_v59, 0 }
 0x3d7   : > { %763 = vmatpush.bf16.msra.mxu2 %v754_v60 }
 0x3d9   : > { %v737_v62 = vpop.f32.mrf.mxu1 }
 0x3da   : > { %928 = vmatmul.msk.bf16.vlgmr.msra.gmra.mxu2 %vm748_vm10, %v740_v61 }
 0x45d   : > { %v765_v2 = vpop.f32.mrf.mxu2 }
 0x45e   : > { %v766_v1 = vadd.f32 %v765_v2, %v746_v0 }
 0x460   : > { %v769_v3 = vmax.f32 %v766_v1, 0.0 }
 0x462   : > { %v771_v4 = vpack.c.bf16 %v769_v3, %v769_v3 }
 0x464   : > { %v782_v5 = vsel %vm752_vm9, %v771_v4, 0 }
 0x465   : > { %v767_v6 = vpop.f32.mrf.mxu2  ;;  %791 = vmatpush.bf16.msrb.mxu0 %v782_v5 }
 0x468   : > { %929 = vmatmul.msk.bf16.vlgmr.msrb.gmra.mxu0 %vm748_vm10, %v770_v7 }
 0x4e5   : > { %v793_v9 = vpop.f32.mrf.mxu0 }
 0x4e6   : > { %v794_v10 = vadd.f32 %v793_v9, %v776_v8 }
 0x4e8   : > { %v797_v11 = vadd.f32 %v794_v10, %v739_v58 }
 0x4ea   : > { %798 = vst.msk [vmem:[%s437_s29] sm:$0xff] %vm449_vm0, %v797_v11 }
 0x4eb   : > { %1136 = shalt.err (!%p1133_p8)
}
 0x4ec   : > { %945 = dma.vmem_to_hbm [thread:$0]  (%p1300_p11), %s813_s16, 128, %s815_s24, %s800_s25  }
 0x4ed   : > { %v795_v12 = vpop.f32.mrf.mxu0 }
 0x4ee PF: > { %s1517_s17 = sld [smem:[#allocation12_spill]]  ;;  %p1519_p9 = scmp.ge.s32.totalorder %s1179_s20, 2 }
 0x4f0   : > { %p959_p10 = pnand %p1519_p9, %p1304_p12 }
 0x4f2   : > { %p960_p1 = pneg %p959_p10 }
 0x4f4   : > { %s826_s13 = sand.u32 1, %s1517_s17  }
 0x4f5   : > { %s827_s15 = scalar_lea.sflag [#allocation4], %s826_s13 }
 0x4f6   : > { %1162 = dma.done.wait (%p960_p1), %s827_s15, 128  }
 0x4f7   : > { %1164 = vsyncadd (%p960_p1), %s827_s15, 4294967168  ;;  %s1520_s20 = sld [smem:[#allocation14_spill]]  ;;  %s1523_s17 = smov %s1171_s18 }
 0x4f8   : > { %s1521_s27 = sld [smem:[#allocation13_spill]] }
 0x4f9   : > { %s1522_s19 = sld [smem:[#allocation15_spill]] }
 0x4fd   : > { %p25_p2 = scmp.ge.s32.totalorder %s1520_s20, 4  }
 0x4fe   : > { %s1524_s18 = smov %s1521_s27 }
 0x4ff   :  { %27 = sbr.rel (!%p25_p2) target bundleno = 11 (0xb), region = 117 }
 0x504   :  { %833 = vsyncpa [#allocation3], 1 }
 0x505   :  { %835 = vsyncpa [#allocation3 + $0x1], 1 }
 0x506   :  { %836 = vsyncpa [#allocation6], 1 }
 0x507   :  { %837 = vsyncpa [#allocation4], 1 }
 0x508   :  { %839 = vsyncpa [#allocation4 + $0x1], 1 }

</bundles_post_ra>
